<compile_context>
chip_gen: v5e
topology: v5e:2x2
jax: 0.10.0
libtpu: 0.0.40
codegen_flags: <defaults>
</compile_context>

<pallas_src>
import functools

import jax
import jax.numpy as jnp
from jax import lax
from jax.experimental import pallas as pl
from jax.experimental.pallas import tpu as pltpu

_LANES = 128
_MAX_BLK_R = 8192          # 8192 rows x 128 lanes x (4 B f32 + 4 B i32) = 8 MiB / step
_NUM_SUMS = 3              # [S_x, S_t1, I1]
_MIN_KERNEL_ROWS = 8       # below this a kernel launch is not worth it; use pure JAX


def _round_up(a, b):
    return ((a + b - 1) // b) * b


def _iou_sums_kernel(x_ref, t_ref, acc_ref, *, inner, blk_r, total_rows, exact):
    """Accumulate the three global sums needed for binary IoU.

    x_ref  : (blk_r, 128) f32 VMEM -- probability of class 1
    t_ref  : (blk_r, 128) i32 VMEM -- labels, assumed to be in {0, 1}
    acc_ref: (1, 3, 8, 128) f32 VMEM output block, resident across the inner
             (reduction) grid axis. acc[0, k] holds per-(sublane, lane)
             partials of k = 0: S_x, 1: S_t1 (count label==1), 2: I1 (sum x*[t==1]).
    """
    @pl.when(pl.program_id(1) == 0)
    def _init():
        acc_ref[...] = jnp.zeros_like(acc_ref)

    x = x_ref[...]
    # Labels are {0, 1}: the class-1 one-hot is a direct cast (no compare).
    t1 = t_ref[...].astype(jnp.float32)

    def fold(v):
        # (blk_r, 128) -> (8, 128): tile-aligned reshape + leading-axis sum,
        # i.e. pure vreg adds on the VPU (no cross-lane / cross-sublane work).
        return v.reshape(blk_r // 8, 8, _LANES).sum(axis=0)

    def accumulate(xv, tv):
        acc_ref[0, 0, :, :] += fold(xv)        # S_x
        acc_ref[0, 1, :, :] += fold(tv)        # S_t1
        acc_ref[0, 2, :, :] += fold(xv * tv)   # I1

    if exact:
        # The grid tiles the rows exactly: no masking anywhere (fast path only).
        accumulate(x, t1)
    else:
        start = (pl.program_id(0) * inner + pl.program_id(1)) * blk_r
        is_full = start + blk_r <= total_rows

        @pl.when(is_full)
        def _full_tile():                      # unmasked fast path
            accumulate(x, t1)

        @pl.when(jnp.logical_not(is_full))
        def _ragged_tile():                    # only the straddling / OOB tile pays for the mask
            rows = start + lax.broadcasted_iota(jnp.int32, (blk_r, _LANES), 0)
            valid = rows < total_rows
            accumulate(jnp.where(valid, x, 0.0), jnp.where(valid, t1, 0.0))


def _iou_sums_pallas(x2d, t2d):
    """x2d: (R, 128) f32, t2d: (R, 128) i32 -> jnp array [S_x, S_t1, I1]."""
    R = x2d.shape[0]
    blk_r = min(_MAX_BLK_R, _round_up(pl.cdiv(R, 2), 8))
    inner = pl.cdiv(R, 2 * blk_r)
    last_blk = pl.cdiv(R, blk_r) - 1
    exact = (2 * inner * blk_r == R)

    def row_map(c, i):
        b = c * inner + i
        if not exact:
            # Clamp so a fully out-of-range tile re-reads the last valid tile
            # (its contribution is masked to zero in-kernel).
            b = jnp.minimum(b, last_blk)
        return (b, 0)

    kernel = functools.partial(
        _iou_sums_kernel, inner=inner, blk_r=blk_r, total_rows=R, exact=exact)

    # TODO(synk): verify on xprof that the leading 2-wide "parallel" axis really
    # shards across v7x's two TensorCores; if not, switch it to CORE_PARALLEL.
    partial = pl.pallas_call(
        kernel,
        out_shape=jax.ShapeDtypeStruct((2, _NUM_SUMS, 8, _LANES), jnp.float32),
        grid_spec=pltpu.PrefetchScalarGridSpec(
            num_scalar_prefetch=0,
            grid=(2, inner),
            in_specs=[
                pl.BlockSpec((blk_r, _LANES), row_map),   # probabilities (f32)
                pl.BlockSpec((blk_r, _LANES), row_map),   # labels (int32, native)
            ],
            out_specs=pl.BlockSpec((1, _NUM_SUMS, 8, _LANES),
                                   lambda c, i: (c, 0, 0, 0)),
        ),
        compiler_params=pltpu.CompilerParams(
            dimension_semantics=("parallel", "arbitrary"),
            vmem_limit_bytes=48 * 1024 * 1024,
        ),
    )(x2d, t2d)

    # Tiny finish: combine both core slices and all (sublane, lane) partials.
    return jnp.sum(partial, axis=(0, 2, 3))


def _sums_jax(x, t):
    """Pure-JAX fallback for tiny inputs / sub-row tails."""
    t1 = t.astype(jnp.float32)
    return jnp.stack([jnp.sum(x), jnp.sum(t1), jnp.sum(x * t1)])


def _iou_sums(inputs, target):
    """Returns jnp array [S_x, S_t1, I1] (shape (3,), float32)."""
    flat_x = inputs.reshape(-1).astype(jnp.float32)    # no-op cast for f32 inputs
    flat_t = target.reshape(-1).astype(jnp.int32)      # no-op cast for i32 labels
    n = flat_x.shape[0]
    R = n // _LANES
    rem = n - R * _LANES

    if R < _MIN_KERNEL_ROWS:
        return _sums_jax(flat_x, flat_t)

    if rem == 0:
        # Pure reshape of the original buffers -- zero extra HBM passes.
        x2d = flat_x.reshape(R, _LANES)
        t2d = flat_t.reshape(R, _LANES)
    else:
        # TODO(synk): this prefix slice materializes one copy of the bulk; a
        # manual-DMA kernel over the raw 1-D HBM buffer would avoid it for
        # sizes that are not multiples of 128.
        x2d = flat_x[:R * _LANES].reshape(R, _LANES)
        t2d = flat_t[:R * _LANES].reshape(R, _LANES)

    sums = _iou_sums_pallas(x2d, t2d)
    if rem:
        sums = sums + _sums_jax(flat_x[R * _LANES:], flat_t[R * _LANES:])
    return sums


def binary_miou_forward(inputs, target, weight=None, softmax=False, n_classes=2):
    """Faithful port of binary_miou.forward (binary case, n_classes == 2).

    NOTE: labels must be exactly {0, 1}; an ignore label (e.g. 255) would be
    counted as class 0 here, whereas the reference one-hot would zero it out.
    """
    if n_classes != 2:
        raise NotImplementedError(
            "binary_miou Pallas kernel supports n_classes == 2 only "
            "(the reference concat([1 - inputs, inputs]) has 2 channels).")
    if softmax:
        inputs = jax.nn.softmax(inputs, axis=1)
    if weight is None:
        weight = [1] * n_classes
    if inputs.size != target.size:
        raise ValueError("expected inputs with a single class-1 channel "
                         "matching target's element count")

    sums = _iou_sums(inputs, target)
    s_x, s_t1, i1 = sums[0], sums[1], sums[2]
    n_valid = float(target.size)            # statically known -- no kernel work
    smooth = 1e-05

    # Class-1 statistics directly from the kernel.
    y1, z1, inter1 = s_t1, s_x, i1
    # Class-0 statistics derived from the same 3 sums (labels are binary).
    y0 = n_valid - s_t1                     # sum(onehot_0)
    z0 = n_valid - s_x                      # sum(1 - x)
    inter0 = y0 - (s_x - i1)                # sum((1 - x) * onehot_0)

    class_wise_iou = []
    iou = 0.0
    for i, (inter, y, z) in enumerate([(inter0, y0, z0), (inter1, y1, z1)]):
        score = (inter + smooth) / (z + y - inter + smooth)
        class_wise_iou.append(score)        # mirrors class_wise_dice.append(...)
        iou = iou + score * weight[i]       # mirrors `Iou += dice * weight[i]`
    return iou / n_classes


def _reference_forward(inputs, target, n_classes=2):
    """Pure-JAX reference mirroring the PyTorch module, for a sanity check."""
    one_hot = jnp.stack(
        [(target == i) for i in range(n_classes)], axis=1).astype(jnp.float32)
    pred = jnp.concatenate([1.0 - inputs, inputs], axis=1)
    smooth = 1e-05
    iou = 0.0
    for i in range(n_classes):
        s = pred[:, i]
        t = one_hot[:, i]
        intersect = jnp.sum(s * t)
        y_sum = jnp.sum(t)
        z_sum = jnp.sum(s)
        score = (intersect + smooth) / (z_sum + y_sum - intersect + smooth)
        iou = iou + score * 1
    return iou / n_classes


if __name__ == "__main__":
    key = jax.random.PRNGKey(0)
    k1, k2, k3, k4 = jax.random.split(key, 4)

    # Case 1: lane-aligned size (n % 128 == 0) -> exact tiling, unmasked fast path.
    inputs1 = jax.random.uniform(k1, (2, 1, 64, 64), dtype=jnp.float32)
    target1 = jax.random.randint(k2, (2, 64, 64), 0, 2, dtype=jnp.int32)
    out1 = jax.block_until_ready(binary_miou_forward(inputs1, target1))
    ref1 = jax.block_until_ready(_reference_forward(inputs1, target1))
    assert jnp.allclose(out1, ref1, rtol=1e-4, atol=1e-6), (out1, ref1)

    # Case 2: ragged size -> in-kernel masked last tile + sub-row JAX tail.
    inputs2 = jax.random.uniform(k3, (3, 1, 40, 56), dtype=jnp.float32)
    target2 = jax.random.randint(k4, (3, 40, 56), 0, 2, dtype=jnp.int32)
    out2 = jax.block_until_ready(binary_miou_forward(inputs2, target2))
    ref2 = jax.block_until_ready(_reference_forward(inputs2, target2))
    assert jnp.allclose(out2, ref2, rtol=1e-4, atol=1e-6), (out2, ref2)

    print("KERNEL_OK")
</pallas_src>

<mosaic_0001>
module attributes {stable_mosaic.version = 11 : i64} {
  func.func @_iou_sums_kernel(%arg0: i32, %arg1: i32, %arg2: memref<32x128xf32, #tpu.memory_space<vmem>>, %arg3: memref<32x128xi32, #tpu.memory_space<vmem>>, %arg4: memref<1x3x8x128xf32, #tpu.memory_space<vmem>>) attributes {dimension_semantics = [#tpu.dimension_semantics<parallel>, #tpu.dimension_semantics<arbitrary>], iteration_bounds = array<i64: 2, 1>, scalar_prefetch = 0 : i64, scratch_operands = 0 : i64, tpu.core_type = #tpu.core_type<tc>, window_params = [{transform_indices = @transform_0, window_bounds = array<i64: 32, 128>}, {transform_indices = @transform_1, window_bounds = array<i64: 32, 128>}, {transform_indices = @transform_2, window_bounds = array<i64: 1, 3, 8, 128>}]} {
    %c0_i32 = arith.constant 0 : i32
    %0 = arith.cmpi eq, %arg1, %c0_i32 : i32
    %1 = arith.extui %0 : i1 to i32
    %c0_i32_0 = arith.constant 0 : i32
    %2 = arith.cmpi ne, %1, %c0_i32_0 : i32
    scf.if %2 {
      %cst_28 = arith.constant 0.000000e+00 : f32
      %31 = vector.broadcast %cst_28 : f32 to vector<1x3x8x128xf32>
      %c0_29 = arith.constant 0 : index
      %c0_30 = arith.constant 0 : index
      %c0_31 = arith.constant 0 : index
      %c0_32 = arith.constant 0 : index
      %32 = vector.load %arg4[%c0_29, %c0_30, %c0_31, %c0_32] : memref<1x3x8x128xf32, #tpu.memory_space<vmem>>, vector<1x3x8x128xf32>
      tpu.vector_store %arg4[%c0_29, %c0_30, %c0_31, %c0_32], %31 {strides = array<i32>} : memref<1x3x8x128xf32, #tpu.memory_space<vmem>>, vector<1x3x8x128xf32>,
    } else {
    }
    %c0 = arith.constant 0 : index
    %c0_1 = arith.constant 0 : index
    %3 = vector.load %arg2[%c0, %c0_1] : memref<32x128xf32, #tpu.memory_space<vmem>>, vector<32x128xf32>
    %c0_2 = arith.constant 0 : index
    %c0_3 = arith.constant 0 : index
    %4 = vector.load %arg3[%c0_2, %c0_3] : memref<32x128xi32, #tpu.memory_space<vmem>>, vector<32x128xi32>
    %5 = arith.sitofp %4 : vector<32x128xi32> to vector<32x128xf32>
    %c0_4 = arith.constant 0 : index
    %c0_5 = arith.constant 0 : index
    %c0_6 = arith.constant 0 : index
    %c0_7 = arith.constant 0 : index
    %6 = vector.load %arg4[%c0_4, %c0_5, %c0_6, %c0_7] : memref<1x3x8x128xf32, #tpu.memory_space<vmem>>, vector<1x1x8x128xf32>
    %7 = vector.shape_cast %6 : vector<1x1x8x128xf32> to vector<8x128xf32>
    %8 = vector.shape_cast %3 : vector<32x128xf32> to vector<4x8x128xf32>
    %cst = arith.constant dense<0.000000e+00> : vector<8x128xf32>
    %9 = vector.multi_reduction <add>, %8, %cst [0] : vector<4x8x128xf32> to vector<8x128xf32>
    %10 = arith.addf %7, %9 : vector<8x128xf32>
    %c0_8 = arith.constant 0 : index
    %c0_9 = arith.constant 0 : index
    %c0_10 = arith.constant 0 : index
    %c0_11 = arith.constant 0 : index
    %11 = vector.load %arg4[%c0_8, %c0_9, %c0_10, %c0_11] : memref<1x3x8x128xf32, #tpu.memory_space<vmem>>, vector<1x1x8x128xf32>
    %12 = vector.shape_cast %11 : vector<1x1x8x128xf32> to vector<8x128xf32>
    %13 = vector.shape_cast %10 : vector<8x128xf32> to vector<1x1x8x128xf32>
    tpu.vector_store %arg4[%c0_8, %c0_9, %c0_10, %c0_11], %13 {strides = array<i32>} : memref<1x3x8x128xf32, #tpu.memory_space<vmem>>, vector<1x1x8x128xf32>,
    %c0_12 = arith.constant 0 : index
    %c1 = arith.constant 1 : index
    %c0_13 = arith.constant 0 : index
    %c0_14 = arith.constant 0 : index
    %14 = vector.load %arg4[%c0_12, %c1, %c0_13, %c0_14] : memref<1x3x8x128xf32, #tpu.memory_space<vmem>>, vector<1x1x8x128xf32>
    %15 = vector.shape_cast %14 : vector<1x1x8x128xf32> to vector<8x128xf32>
    %16 = vector.shape_cast %5 : vector<32x128xf32> to vector<4x8x128xf32>
    %cst_15 = arith.constant dense<0.000000e+00> : vector<8x128xf32>
    %17 = vector.multi_reduction <add>, %16, %cst_15 [0] : vector<4x8x128xf32> to vector<8x128xf32>
    %18 = arith.addf %15, %17 : vector<8x128xf32>
    %c0_16 = arith.constant 0 : index
    %c1_17 = arith.constant 1 : index
    %c0_18 = arith.constant 0 : index
    %c0_19 = arith.constant 0 : index
    %19 = vector.load %arg4[%c0_16, %c1_17, %c0_18, %c0_19] : memref<1x3x8x128xf32, #tpu.memory_space<vmem>>, vector<1x1x8x128xf32>
    %20 = vector.shape_cast %19 : vector<1x1x8x128xf32> to vector<8x128xf32>
    %21 = vector.shape_cast %18 : vector<8x128xf32> to vector<1x1x8x128xf32>
    tpu.vector_store %arg4[%c0_16, %c1_17, %c0_18, %c0_19], %21 {strides = array<i32>} : memref<1x3x8x128xf32, #tpu.memory_space<vmem>>, vector<1x1x8x128xf32>,
    %c0_20 = arith.constant 0 : index
    %c2 = arith.constant 2 : index
    %c0_21 = arith.constant 0 : index
    %c0_22 = arith.constant 0 : index
    %22 = vector.load %arg4[%c0_20, %c2, %c0_21, %c0_22] : memref<1x3x8x128xf32, #tpu.memory_space<vmem>>, vector<1x1x8x128xf32>
    %23 = vector.shape_cast %22 : vector<1x1x8x128xf32> to vector<8x128xf32>
    %24 = arith.mulf %3, %5 : vector<32x128xf32>
    %25 = vector.shape_cast %24 : vector<32x128xf32> to vector<4x8x128xf32>
    %cst_23 = arith.constant dense<0.000000e+00> : vector<8x128xf32>
    %26 = vector.multi_reduction <add>, %25, %cst_23 [0] : vector<4x8x128xf32> to vector<8x128xf32>
    %27 = arith.addf %23, %26 : vector<8x128xf32>
    %c0_24 = arith.constant 0 : index
    %c2_25 = arith.constant 2 : index
    %c0_26 = arith.constant 0 : index
    %c0_27 = arith.constant 0 : index
    %28 = vector.load %arg4[%c0_24, %c2_25, %c0_26, %c0_27] : memref<1x3x8x128xf32, #tpu.memory_space<vmem>>, vector<1x1x8x128xf32>
    %29 = vector.shape_cast %28 : vector<1x1x8x128xf32> to vector<8x128xf32>
    %30 = vector.shape_cast %27 : vector<8x128xf32> to vector<1x1x8x128xf32>
    tpu.vector_store %arg4[%c0_24, %c2_25, %c0_26, %c0_27], %30 {strides = array<i32>} : memref<1x3x8x128xf32, #tpu.memory_space<vmem>>, vector<1x1x8x128xf32>,
    return
  }
  func.func @transform_0(%arg0: i32, %arg1: i32) -> (i32, i32) {
    %c1_i32 = arith.constant 1 : i32
    %0 = arith.muli %arg0, %c1_i32 : i32
    %1 = arith.addi %0, %arg1 : i32
    %c0_i32 = arith.constant 0 : i32
    %c0_i32_0 = arith.constant 0 : i32
    return %1, %c0_i32 : i32, i32
  }
  func.func @transform_1(%arg0: i32, %arg1: i32) -> (i32, i32) {
    %c1_i32 = arith.constant 1 : i32
    %0 = arith.muli %arg0, %c1_i32 : i32
    %1 = arith.addi %0, %arg1 : i32
    %c0_i32 = arith.constant 0 : i32
    %c0_i32_0 = arith.constant 0 : i32
    return %1, %c0_i32 : i32, i32
  }
  func.func @transform_2(%arg0: i32, %arg1: i32) -> (i32, i32, i32, i32) {
    %c0_i32 = arith.constant 0 : i32
    %c0_i32_0 = arith.constant 0 : i32
    %c0_i32_1 = arith.constant 0 : i32
    %c0_i32_2 = arith.constant 0 : i32
    return %arg0, %c0_i32, %c0_i32_0, %c0_i32_1 : i32, i32, i32, i32
  }
}

</mosaic_0001>

<bundles_post_ra>
// kernel: tpu_custom_call.1
= control target key start
LH: loop header
LB: loop body
LE: loop exit
PB: predicated region body
PF: predicated region fallthrough
CT: control target
= control target key end

     0   :  { %7 = vsyncpa [#allocation3], 0  ;;  %s798_s0 = inlined_call_operand.hbm [shape: f32[64,128], index: 0, kind: input, shape index: {}]   ;;  %s799_s1 = inlined_call_operand.hbm [shape: s32[64,128], index: 1, kind: input, shape index: {}]   ;;  %s800_s2 = inlined_call_operand.hbm [shape: f32[2,3,8,128], index: 2, kind: output, shape index: {}]  }
   0x1   :  { %9 = vsyncpa [#allocation3 + $0x1], 0 }
   0x2   :  { %10 = vsyncpa [#allocation6], 0 }
   0x3   :  { %12 = vsyncpa [#allocation6 + $0x1], 0 }
   0x4   :  { %13 = vsyncpa [#allocation4], 0 }
   0x5   :  { %15 = vsyncpa [#allocation4 + $0x1], 0  ;;  %s656_s9 = smov 0   ;;  %s658_s10 = smov 0  }
   0x6   :  { %s660_s11 = smov 0   ;;  %s662_s12 = smov 0  }
   0x7   :  { %s664_s13 = smov 0   ;;  %s666_s14 = smov 0  }
   0x8 LB: > { %s393_s15 = sadd.s32 4294967295, %s635_s14   ;;  %s394_s16 = sadd.s32 4294967294, %s635_s14   ;;  %s635_s14 = sphi %s666_s14, %s21_s14   ;;  %s631_s13 = sphi %s664_s13, %s810_s13   ;;  %s627_s12 = sphi %s662_s12, %s809_s12   ;;  %s623_s11 = sphi %s660_s11, %s808_s11   ;;  %s619_s10 = sphi %s658_s10, %s807_s10   ;;  %s615_s9 = sphi %s656_s9, %s806_s9  }
   0x9   : > { %s33_s17 = sadd.s32 1, %s631_s13  ;;  %s42_s18 = sadd.s32 1, %s623_s11 }
   0xa   : > { %p35_p0 = scmp.ge.s32.totalorder %s33_s17, 2  ;;  %p49_p1 = scmp.ne.s32.totalorder %s623_s11, %s619_s10 }
   0xb   : > { %p50_p2 = scmp.eq.s32.totalorder %s635_s14, 0  ;;  %p55_p3 = scmp.ne.s32.totalorder %s619_s10, %s615_s9 }
   0xc   : > { %s812_s17 = smov (%p35_p0, %s33_s17), 0  ;;  %p56_p5 = scmp.eq.s32.totalorder %s393_s15, 0 }
   0xd   : > { %p697_p4 = por %p50_p2, %p49_p1  ;;  %s39_s20 = ssub.s32 %s631_s13, %s812_s17 }
   0xe   : > { %p107_p6 = scmp.eq.s32.totalorder %s393_s15, 1  ;;  %p40_p7 = scmp.eq.s32.totalorder %s39_s20, 0 }
   0xf   : > { %p703_p8 = por %p56_p5, %p55_p3  ;;  %p113_p10 = scmp.eq.s32.totalorder %s394_s16, 1 }
  0x10   : > { %p707_p9 = por %p107_p6, %p49_p1  ;;  %p396_p12 = scmp.ge.s32.totalorder %s635_s14, 2 }
  0x11   : > { %s712_s23 = scalar_select %p40_p7, %s623_s11, %s42_s18  }
  0x12   : > { %p714_p11 = por %p113_p10, %p55_p3  ;;  %p434_p13 = scmp.lt.s32.totalorder %s635_s14, 2 }
  0x13   : > { %s721_s25 = sand.u32 1, %s623_s11   ;;  %s413_s27 = sshll.u32 %s631_s13, 5 }
  0x14   : > { %s397_s26 = sshll.u32 %s721_s25, 5  ;;  %s143_s30 = scalar_lea.hbm %s798_s0, %s413_s27 }
  0x15   : > { %s137_s3 = scalar_lea.vmem [#allocation2], %s397_s26  ;;  %s144_s5 = sshll.u32 %s143_s30, 4  ;;  %s145_s5 = int_to_ptr.hbm [resolvable:$true] %s144_s5 }
  0x16   : > { %s146_s4 = sshll.u32 %s137_s3, 4  ;;  %p730_p0 = pnand %p434_p13, %p697_p4  ;;  %s147_s4 = int_to_ptr.vmem [resolvable:$true] %s146_s4 }
  0x17   : > { %p403_p1 = scmp.ge.s32.totalorder %s635_s14, 1  ;;  %s134_s7 = scalar_lea.sflag [#allocation3], %s721_s25 }
  0x18   : > { %s637_s8 = smov 128   ;;  %s638_s15 = smov 8  }
  0x19   : > { %426 = dma.hbm_to_vmem [thread:$0]  (!%p730_p0), %s145_s5, 512, %s147_s4, %s134_s7, %s637_s8, %s637_s8, %s638_s15  }
  0x1a   : > { %p177_p2 = scmp.lt.s32.totalorder %s635_s14, 3  ;;  %s166_s20 = scalar_lea.hbm %s799_s1, %s413_s27 }
  0x1b   : > { %s167_s28 = sshll.u32 %s166_s20, 4  ;;  %s160_s19 = scalar_lea.vmem [#allocation5], %s397_s26  ;;  %s168_s28 = int_to_ptr.hbm [resolvable:$true] %s167_s28 }
  0x1c   : > { %p178_p3 = pnand %p403_p1, %p177_p2  ;;  %s169_s29 = sshll.u32 %s160_s19, 4  ;;  %s170_s29 = int_to_ptr.vmem [resolvable:$true] %s169_s29 }
  0x1d   : > { %s157_s30 = scalar_lea.sflag [#allocation6], %s721_s25  ;;  %s746_s3 = sand.u32 (!%p178_p3), 1, %s619_s10  }
  0x1e   : > { %429 = dma.hbm_to_vmem [thread:$0]  (!%p730_p0), %s168_s28, 512, %s170_s29, %s157_s30, %s637_s8, %s637_s8, %s638_s15  }
  0x1f   : > { %181 = sbr.rel (%p178_p3) target bundleno = 57 (0x39), region = 28  ;;  %s404_s4 = sshll.u32 (!%p178_p3), %s746_s3, 5 }
  0x20   : > { %s184_s5 = scalar_lea.sflag (!%p178_p3), [#allocation3], %s746_s3  ;;  %s187_s7 = scalar_lea.vmem (!%p178_p3), [#allocation2], %s404_s4 }
  0x24   : > { %602 = dma.done.wait (%p703_p8), %s184_s5, 512  }
  0x25   : > { %604 = vsyncadd (%p703_p8), %s184_s5, 4294966784  ;;  %s194_s25 = scalar_lea.sflag [#allocation6], %s746_s3  ;;  %s197_s26 = scalar_lea.vmem [#allocation5], %s404_s4 }
  0x26   : > { %606 = dma.done.wait (%p703_p8), %s194_s25, 512  }
  0x27   : > { %608 = vsyncadd (%p703_p8), %s194_s25, 4294966784  ;;  %v235_v0 = vld [vmem:[%s187_s7] sm:$0xff]  ;;  %v236_v1 = vld [vmem:[%s187_s7 + $0x8] sm:$0xff]  ;;  %s415_s27 = smul.u32 24, %s746_s3  ;;  %s272_s20 = scalar_lea.sflag [#allocation4], %s746_s3 }
  0x28   : > { %v248_v2 = vadd.f32 %v236_v1, %v235_v0  ;;  %v239_v3 = vld [vmem:[%s197_s26] sm:$0xff]  ;;  %v240_v4 = vld [vmem:[%s197_s26 + $0x8] sm:$0xff]  ;;  %v237_v5 = vld [vmem:[%s187_s7 + $0x10] sm:$0xff]  ;;  %s416_s6 = smul.u32 24, %s627_s12  ;;  %s569_s4 = scalar_lea.hbm %s800_s2, 48 }
  0x29   : > { %v241_v6 = vld [vmem:[%s197_s26 + $0x10] sm:$0xff]  ;;  %v242_v7 = vld [vmem:[%s197_s26 + $0x18] sm:$0xff]  ;;  %v243_v8 = vcvt.s32.f32 %v239_v3  ;;  %v244_v9 = vcvt.s32.f32 %v240_v4  ;;  %s223_s12 = scalar_lea.vmem [#allocation7], %s415_s27 }
  0x2a   : > { %v238_v10 = vld [vmem:[%s187_s7 + $0x18] sm:$0xff]  ;;  %v249_v11 = vadd.f32 %v248_v2, %v237_v5  ;;  %v245_v12 = vcvt.s32.f32 %v241_v6  ;;  %v246_v13 = vcvt.s32.f32 %v242_v7  ;;  %s283_s15 = scalar_lea.hbm %s800_s2, %s416_s6  ;;  %s284_s16 = sshll.u32 %s223_s12, 4  ;;  %s285_s16 = int_to_ptr.vmem [resolvable:$true] %s284_s16 }
  0x2b   : > { %v255_v14 = vadd.f32 %v244_v9, %v243_v8  ;;  %v262_v15 = vmul.f32 %v243_v8, %v235_v0  ;;  %v263_v16 = vmul.f32 %v244_v9, %v236_v1  ;;  %s286_s18 = sshll.u32 %s283_s15, 4  ;;  %s287_s18 = int_to_ptr.hbm [resolvable:$true] %s286_s18 }
  0x2c   : > { %v250_v17 = vadd.f32 %v249_v11, %v238_v10  ;;  %v264_v18 = vmul.f32 %v245_v12, %v237_v5  ;;  %v265_v20 = vmul.f32 %v246_v13, %v238_v10  ;;  %s563_s28 = sshra.s32 %s287_s18, 4  ;;  %s564_s28 = int_to_ptr.hbm [resolvable:$true] %s563_s28 }
  0x2d   : > { %v256_v19 = vadd.f32 %v255_v14, %v245_v12  ;;  %v266_v21 = vadd.f32 %v263_v16, %v262_v15  ;;  %s565_s19 = scalar_lea.hbm %s564_s28, 24  ;;  %p570_p7 = scmp.lt.s32.totalorder %s564_s28, %s800_s2 }
  0x2e   : > { %252 = vst [vmem:[%s223_s12] sm:$0xff] %v250_v17  ;;  %p566_p4 = scmp.ne.s32.totalorder %s564_s28, %s565_s19  ;;  %p571_p8 = scmp.lt.s32.totalorder %s569_s4, %s565_s19 }
  0x2f   : > { %v257_v22 = vadd.f32 %v256_v19, %v246_v13  ;;  %v267_v23 = vadd.f32 %v266_v21, %v264_v18 }
  0x30   : > { %p567_p5 = pnand %p566_p4, %p707_p9  ;;  %p572_p10 = por %p571_p8, %p570_p7 }
  0x31   : > { %v268_v24 = vadd.f32 %v267_v23, %v265_v20  ;;  %407 = vst [vmem:[%s223_s12 + $0x8] sm:$0xff] %v257_v22 }
  0x32   : > { %p568_p6 = pneg %p567_p5 }
  0x33   : > { %409 = vst [vmem:[%s223_s12 + $0x10] sm:$0xff] %v268_v24 }
  0x34   : > { %p573_p13 = pnand %p572_p10, %p568_p6 }
  0x36   : > { %576 = shalt.err (!%p573_p13)
}
  0x37   : > { %s639_s3 = smov 128   ;;  %s640_s25 = smov 8  }
  0x38   : > { %421 = dma.vmem_to_hbm [thread:$0]  (%p707_p9), %s285_s16, 384, %s287_s18, %s272_s20, %s639_s3, %s639_s3, %s640_s25  }
  0x39 PF: > { %s301_s26 = sand.u32 1, %s615_s9   ;;  %p431_p0 = pnand %p396_p12, %p714_p11 }
  0x3a   : > { %s302_s27 = scalar_lea.sflag [#allocation4], %s301_s26 }
  0x3b   : > { %p432_p1 = pneg %p431_p0 }
  0x3d   : > { %610 = dma.done.wait (%p432_p1), %s302_s27, 384  }
  0x3e   : > { %612 = vsyncadd (%p432_p1), %s302_s27, 4294966912  ;;  %s21_s14 = sadd.s32 1, %s635_s14   ;;  %s806_s9 = smov %s619_s10 }
  0x3f   : > { %p18_p2 = scmp.ge.s32.totalorder %s21_s14, 4   ;;  %s807_s10 = smov %s623_s11 }
  0x40   : > { %s808_s11 = smov %s712_s23  ;;  %s809_s12 = smov %s631_s13 }
  0x41   : > { %s810_s13 = smov %s812_s17  ;;  %20 = sbr.rel (!%p18_p2) target bundleno = 8 (0x8), region = 92 }
  0x46   :  { %308 = vsyncpa [#allocation3], 1 }
  0x47   :  { %310 = vsyncpa [#allocation3 + $0x1], 1 }
  0x48   :  { %311 = vsyncpa [#allocation6], 1 }
  0x49   :  { %313 = vsyncpa [#allocation6 + $0x1], 1 }
  0x4a   :  { %314 = vsyncpa [#allocation4], 1 }
  0x4b   :  { %316 = vsyncpa [#allocation4 + $0x1], 1 }

</bundles_post_ra>
